<compile_context>
chip_gen: v6e
topology: v6e:2x2x1
jax: 0.10.0
libtpu: 0.0.40
codegen_flags: <defaults>
</compile_context>

<pallas_src>
import functools

import jax
import jax.numpy as jnp
from jax.experimental import pallas as pl
from jax.experimental.pallas import tpu as pltpu


def _round_up(x, m):
    return ((x + m - 1) // m) * m


def _sigmoid_linear_kernel(c_ref, d_ref, c_out_ref, d_out_ref, *, inv_two_range):
    """Fused box transformer for the piecewise-linear (hard) sigmoid.

    c_ref, d_ref         : [tb, Dp] center / radius tiles (inputs)
    c_out_ref, d_out_ref : [tb, Dp] center / radius tiles (outputs)
    inv_two_range        : Python float, 1 / (2 * sig_range), baked at trace time
    """
    # Compute in f32 regardless of the I/O dtype (v5e VPU has no bf16 ALUs;
    # the HBM-byte saving from narrow I/O is what matters, not the math dtype).
    c = c_ref[...].astype(jnp.float32)
    d = d_ref[...].astype(jnp.float32)
    lo = jnp.clip((c - d) * inv_two_range + 0.5, 0.0, 1.0)
    hi = jnp.clip((c + d) * inv_two_range + 0.5, 0.0, 1.0)
    c_out_ref[...] = ((hi + lo) * 0.5).astype(c_out_ref.dtype)
    d_out_ref[...] = ((hi - lo) * 0.5).astype(d_out_ref.dtype)


def _pick_block_rows(b_padded, d_padded, itemsize, sublane_align, block_bytes_per_array):
    """Rows per block from a byte budget; biased toward >= 2 grid steps."""
    rows = int(block_bytes_per_array) // (d_padded * itemsize)
    rows = max(sublane_align, (rows // sublane_align) * sublane_align)
    rows = min(rows, b_padded)
    # If the whole batch would be a single block but is splittable, use two
    # blocks so the "parallel" grid axis can shard across v7x's 2 TensorCores.
    if rows >= b_padded and b_padded >= 2 * sublane_align:
        rows = _round_up(-(-b_padded // 2), sublane_align)
    return rows


def sigmoid_linear_box(c, delta, sig_range, *, block_bytes_per_array=1.5 * (1 << 20)):
    """Apply SigmoidLinear.forward to a box (c, delta) with one fused kernel."""
    assert c.shape == delta.shape and c.ndim == 2
    B, D = c.shape
    itemsize = jnp.dtype(c.dtype).itemsize
    # Sublane packing: 8 rows for 32-bit, 16 for 16-bit, 32 for 8-bit dtypes.
    sublane_align = max(8, 32 // itemsize)

    # Pad features to a lane multiple (unmasked full-width vst) and batch to
    # the sublane alignment.  Padding is sliced off after the call.
    Dp = _round_up(D, 128)
    Bp = _round_up(B, sublane_align)
    if (Bp, Dp) != (B, D):
        pad = ((0, Bp - B), (0, Dp - D))
        c = jnp.pad(c, pad)
        delta = jnp.pad(delta, pad)

    tb = _pick_block_rows(Bp, Dp, itemsize, sublane_align, block_bytes_per_array)
    grid = (pl.cdiv(Bp, tb),)  # clipped last block; no tb=B fallback

    spec = pl.BlockSpec((tb, Dp), lambda i: (i, 0))
    kernel = functools.partial(
        _sigmoid_linear_kernel, inv_two_range=float(1.0 / (2.0 * sig_range))
    )

    n_elem = Bp * Dp
    cost = pl.CostEstimate(
        flops=10 * n_elem,                      # a handful of VPU ops per element
        transcendentals=0,
        bytes_accessed=4 * n_elem * itemsize,   # 2 inputs + 2 outputs
    )

    c_out, d_out = pl.pallas_call(
        kernel,
        out_shape=(
            jax.ShapeDtypeStruct((Bp, Dp), c.dtype),
            jax.ShapeDtypeStruct((Bp, Dp), delta.dtype),
        ),
        grid=grid,
        in_specs=[spec, spec],
        out_specs=(spec, spec),
        compiler_params=pltpu.CompilerParams(dimension_semantics=("parallel",)),
        cost_estimate=cost,
    )(c, delta)

    if (Bp, Dp) != (B, D):
        c_out = c_out[:B, :D]
        d_out = d_out[:B, :D]
    return c_out, d_out


def sigmoid_linear_forward(x, sig_range):
    """JAX equivalent of SigmoidLinear.forward on a box abstract value."""
    c_out, d_out = sigmoid_linear_box(x["c"], x["delta"], sig_range)
    return {"c": c_out, "delta": d_out}


def _reference(c, d, sig_range):
    def f(t):
        return jnp.clip(t / (2.0 * sig_range) + 0.5, 0.0, 1.0)

    lo = f(c - d)
    hi = f(c + d)
    return (hi + lo) * 0.5, (hi - lo) * 0.5


if __name__ == "__main__":
    key = jax.random.PRNGKey(0)
    kc, kd = jax.random.split(key, 2)
    sig_range = 4.0  # module hyper-parameter (compile-time constant)

    # --- primary demo: lane-aligned small shape (B=8, D=128), f32 ------------
    B, D = 8, 128
    x = {
        "c": 3.0 * jax.random.normal(kc, (B, D), dtype=jnp.float32),
        "delta": jnp.abs(jax.random.normal(kd, (B, D), dtype=jnp.float32)),
    }
    out = sigmoid_linear_forward(x, sig_range)
    jax.block_until_ready(out["c"])
    jax.block_until_ready(out["delta"])

    c_ref, d_ref = _reference(x["c"], x["delta"], sig_range)
    assert jnp.allclose(out["c"], c_ref, atol=1e-6), "center mismatch (f32)"
    assert jnp.allclose(out["delta"], d_ref, atol=1e-6), "delta mismatch (f32)"
    assert bool(jnp.all(out["delta"] >= 0.0))
    assert bool(jnp.all(out["c"] - out["delta"] >= -1e-6))
    assert bool(jnp.all(out["c"] + out["delta"] <= 1.0 + 1e-6))

    # --- unaligned shape: exercises B/D padding + clipped ragged last block --
    B2, D2 = 50, 100
    k2c, k2d = jax.random.split(jax.random.PRNGKey(1), 2)
    c2 = 3.0 * jax.random.normal(k2c, (B2, D2), dtype=jnp.float32)
    d2 = jnp.abs(jax.random.normal(k2d, (B2, D2), dtype=jnp.float32))
    c2_out, d2_out = sigmoid_linear_box(c2, d2, sig_range)
    jax.block_until_ready(c2_out)
    c2_ref, d2_ref = _reference(c2, d2, sig_range)
    assert jnp.allclose(c2_out, c2_ref, atol=1e-6), "center mismatch (padded)"
    assert jnp.allclose(d2_out, d2_ref, atol=1e-6), "delta mismatch (padded)"

    # --- bf16 I/O path: halves HBM traffic; compute stays f32 in-kernel ------
    c3 = x["c"].astype(jnp.bfloat16)
    d3 = x["delta"].astype(jnp.bfloat16)
    c3_out, d3_out = sigmoid_linear_box(c3, d3, sig_range)
    jax.block_until_ready(c3_out)
    c3_ref, d3_ref = _reference(c3.astype(jnp.float32), d3.astype(jnp.float32), sig_range)
    assert jnp.allclose(c3_out.astype(jnp.float32), c3_ref, atol=1e-2), "center mismatch (bf16)"
    assert jnp.allclose(d3_out.astype(jnp.float32), d3_ref, atol=1e-2), "delta mismatch (bf16)"

    print("KERNEL_OK")
</pallas_src>

<mosaic_0001>
module attributes {stable_mosaic.version = 11 : i64} {
  func.func @_sigmoid_linear_kernel(%arg0: i32, %arg1: memref<8x128xf32, #tpu.memory_space<vmem>>, %arg2: memref<8x128xf32, #tpu.memory_space<vmem>>, %arg3: memref<8x128xf32, #tpu.memory_space<vmem>>, %arg4: memref<8x128xf32, #tpu.memory_space<vmem>>) attributes {dimension_semantics = [#tpu.dimension_semantics<parallel>], iteration_bounds = array<i64: 1>, scalar_prefetch = 0 : i64, scratch_operands = 0 : i64, tpu.core_type = #tpu.core_type<tc>, window_params = [{transform_indices = @transform_0, window_bounds = array<i64: 8, 128>}, {transform_indices = @transform_1, window_bounds = array<i64: 8, 128>}, {transform_indices = @transform_2, window_bounds = array<i64: 8, 128>}, {transform_indices = @transform_3, window_bounds = array<i64: 8, 128>}]} {
    %c0 = arith.constant 0 : index
    %c0_0 = arith.constant 0 : index
    %0 = vector.load %arg1[%c0, %c0_0] : memref<8x128xf32, #tpu.memory_space<vmem>>, vector<8x128xf32>
    %c0_1 = arith.constant 0 : index
    %c0_2 = arith.constant 0 : index
    %1 = vector.load %arg2[%c0_1, %c0_2] : memref<8x128xf32, #tpu.memory_space<vmem>>, vector<8x128xf32>
    %2 = arith.subf %0, %1 : vector<8x128xf32>
    %cst = arith.constant 1.250000e-01 : f32
    %3 = vector.broadcast %cst : f32 to vector<8x128xf32>
    %4 = arith.mulf %2, %3 : vector<8x128xf32>
    %cst_3 = arith.constant 5.000000e-01 : f32
    %5 = vector.broadcast %cst_3 : f32 to vector<8x128xf32>
    %6 = arith.addf %4, %5 : vector<8x128xf32>
    %cst_4 = arith.constant 0.000000e+00 : f32
    %cst_5 = arith.constant 1.000000e+00 : f32
    %7 = vector.broadcast %cst_4 : f32 to vector<8x128xf32>
    %8 = arith.maximumf %7, %6 : vector<8x128xf32>
    %9 = vector.broadcast %cst_5 : f32 to vector<8x128xf32>
    %10 = arith.minimumf %9, %8 : vector<8x128xf32>
    %11 = arith.addf %0, %1 : vector<8x128xf32>
    %cst_6 = arith.constant 1.250000e-01 : f32
    %12 = vector.broadcast %cst_6 : f32 to vector<8x128xf32>
    %13 = arith.mulf %11, %12 : vector<8x128xf32>
    %cst_7 = arith.constant 5.000000e-01 : f32
    %14 = vector.broadcast %cst_7 : f32 to vector<8x128xf32>
    %15 = arith.addf %13, %14 : vector<8x128xf32>
    %cst_8 = arith.constant 0.000000e+00 : f32
    %cst_9 = arith.constant 1.000000e+00 : f32
    %16 = vector.broadcast %cst_8 : f32 to vector<8x128xf32>
    %17 = arith.maximumf %16, %15 : vector<8x128xf32>
    %18 = vector.broadcast %cst_9 : f32 to vector<8x128xf32>
    %19 = arith.minimumf %18, %17 : vector<8x128xf32>
    %20 = arith.addf %19, %10 : vector<8x128xf32>
    %cst_10 = arith.constant 5.000000e-01 : f32
    %21 = vector.broadcast %cst_10 : f32 to vector<8x128xf32>
    %22 = arith.mulf %20, %21 : vector<8x128xf32>
    %c0_11 = arith.constant 0 : index
    %c0_12 = arith.constant 0 : index
    %23 = vector.load %arg3[%c0_11, %c0_12] : memref<8x128xf32, #tpu.memory_space<vmem>>, vector<8x128xf32>
    tpu.vector_store %arg3[%c0_11, %c0_12], %22 {strides = array<i32>} : memref<8x128xf32, #tpu.memory_space<vmem>>, vector<8x128xf32>,
    %24 = arith.subf %19, %10 : vector<8x128xf32>
    %cst_13 = arith.constant 5.000000e-01 : f32
    %25 = vector.broadcast %cst_13 : f32 to vector<8x128xf32>
    %26 = arith.mulf %24, %25 : vector<8x128xf32>
    %c0_14 = arith.constant 0 : index
    %c0_15 = arith.constant 0 : index
    %27 = vector.load %arg4[%c0_14, %c0_15] : memref<8x128xf32, #tpu.memory_space<vmem>>, vector<8x128xf32>
    tpu.vector_store %arg4[%c0_14, %c0_15], %26 {strides = array<i32>} : memref<8x128xf32, #tpu.memory_space<vmem>>, vector<8x128xf32>,
    return
  }
  func.func @transform_0(%arg0: i32) -> (i32, i32) {
    %c0_i32 = arith.constant 0 : i32
    %c0_i32_0 = arith.constant 0 : i32
    return %arg0, %c0_i32 : i32, i32
  }
  func.func @transform_1(%arg0: i32) -> (i32, i32) {
    %c0_i32 = arith.constant 0 : i32
    %c0_i32_0 = arith.constant 0 : i32
    return %arg0, %c0_i32 : i32, i32
  }
  func.func @transform_2(%arg0: i32) -> (i32, i32) {
    %c0_i32 = arith.constant 0 : i32
    %c0_i32_0 = arith.constant 0 : i32
    return %arg0, %c0_i32 : i32, i32
  }
  func.func @transform_3(%arg0: i32) -> (i32, i32) {
    %c0_i32 = arith.constant 0 : i32
    %c0_i32_0 = arith.constant 0 : i32
    return %arg0, %c0_i32 : i32, i32
  }
}

</mosaic_0001>

<bundles_post_ra>
// kernel: tpu_custom_call.1
= control target key start
LH: loop header
LB: loop body
LE: loop exit
PB: predicated region body
PF: predicated region fallthrough
CT: control target
= control target key end

     0   :  { %9 = vsyncpa [#allocation3], 0  ;;  %s215_s0 = inlined_call_operand.hbm [shape: f32[8,128], index: 0, kind: input, shape index: {}]   ;;  %s216_s1 = inlined_call_operand.hbm [shape: f32[8,128], index: 1, kind: input, shape index: {}]   ;;  %s217_s2 = inlined_call_operand.hbm [shape: f32[8,128], index: 2, kind: output, shape index: {0}]   ;;  %s218_s3 = inlined_call_operand.hbm [shape: f32[8,128], index: 3, kind: output, shape index: {1}]  }
   0x1   :  { %10 = vsyncpa [#allocation6], 0 }
   0x2   :  { %11 = vsyncpa [#allocation4], 0 }
   0x3   :  { %12 = vsyncpa [#allocation9], 0  ;;  %s179_s12 = smov [#allocation2]   ;;  %s180_s14 = smov [#allocation5]  }
   0x4   :  { %s19_s13 = sshll.u32 %s179_s12, 4  ;;  %s29_s15 = sshll.u32 %s180_s14, 4  ;;  %s20_s13 = int_to_ptr.vmem [resolvable:$true] %s19_s13  ;;  %s30_s15 = int_to_ptr.vmem [resolvable:$true] %s29_s15 }
   0x5   :  { %s99_s16 = scalar_lea.vmem %s20_s13, 128  ;;  %p104_p1 = scmp.lt.s32.totalorder %s20_s13, %s20_s13 }
   0x6   :  { %p100_p0 = scmp.ne.s32.totalorder %s20_s13, %s99_s16  ;;  %p105_p2 = scmp.lt.s32.totalorder %s99_s16, %s99_s16 }
   0x8   :  { %p106_p3 = por %p105_p2, %p104_p1 }
   0xa   :  { %p107_p4 = pnand %p106_p3, %p100_p0 }
   0xc   :  { %110 = shalt.err (!%p107_p4)
}
   0xd   :  { %22 = dma.hbm_to_vmem [thread:$0]  %s215_s0, 128, %s20_s13, [#allocation3]  }
   0xe   :  { %s119_s19 = scalar_lea.vmem %s30_s15, 128  ;;  %p124_p6 = scmp.lt.s32.totalorder %s30_s15, %s30_s15 }
   0xf   :  { %p120_p5 = scmp.ne.s32.totalorder %s30_s15, %s119_s19  ;;  %p125_p7 = scmp.lt.s32.totalorder %s119_s19, %s119_s19 }
  0x11   :  { %p126_p8 = por %p125_p7, %p124_p6 }
  0x13   :  { %p127_p9 = pnand %p126_p8, %p120_p5 }
  0x15   :  { %130 = shalt.err (!%p127_p9)
}
  0x16   :  { %32 = dma.hbm_to_vmem [thread:$0]  %s216_s1, 128, %s30_s15, [#allocation6]  }
  0x17   :  { %171 = dma.done.wait [#allocation3], 128  }
  0x18   :  { %172 = vsyncadd [#allocation3], 4294967168 }
  0x19   :  { %173 = dma.done.wait [#allocation6], 128  }
  0x1a   :  { %174 = vsyncadd [#allocation6], 4294967168  ;;  %v39_v0 = vld [vmem:[#allocation2] sm:$0xff]  ;;  %v40_v1 = vld [vmem:[#allocation5] sm:$0xff]  ;;  %s181_s0 = smov [#allocation7]   ;;  %s182_s1 = smov [#allocation8]  }
  0x1b   :  { %v41_v2 = vsub.f32 %v39_v0, %v40_v1  ;;  %v46_v3 = vadd.f32 %v40_v1, %v39_v0  ;;  %s63_s22 = sshll.u32 %s181_s0, 4  ;;  %s73_s23 = sshll.u32 %s182_s1, 4  ;;  %s64_s22 = int_to_ptr.vmem [resolvable:$true] %s63_s22  ;;  %s74_s23 = int_to_ptr.vmem [resolvable:$true] %s73_s23 }
  0x1c   :  { %s131_s24 = scalar_lea.vmem %s64_s22, 128  ;;  %p136_p11 = scmp.lt.s32.totalorder %s64_s22, %s64_s22 }
  0x1d   :  { %v42_v4 = vmul.f32 0.125, %v41_v2  ;;  %v47_v5 = vmul.f32 0.125, %v46_v3  ;;  %p132_p10 = scmp.ne.s32.totalorder %s64_s22, %s131_s24  ;;  %p137_p12 = scmp.lt.s32.totalorder %s131_s24, %s131_s24 }
  0x1f   :  { %v43_v6 = vadd.f32 0.5, %v42_v4  ;;  %v48_v7 = vadd.f32 0.5, %v47_v5  ;;  %p138_p13 = por %p137_p12, %p136_p11 }
  0x21   :  { %v44_v8 = vmax.f32 %v43_v6, 0.0  ;;  %v49_v9 = vmax.f32 %v48_v7, 0.0  ;;  %p139_p0 = pnand %p138_p13, %p132_p10 }
  0x23   :  { %v45_v10 = vmin.f32 %v44_v8, 1.0  ;;  %v50_v11 = vmin.f32 %v49_v9, 1.0 }
  0x25   :  { %v51_v12 = vadd.f32 %v50_v11, %v45_v10  ;;  %v54_v13 = vsub.f32 %v50_v11, %v45_v10 }
  0x27   :  { %v52_v14 = vmul.f32 0.5, %v51_v12  ;;  %v55_v15 = vmul.f32 0.5, %v54_v13 }
  0x29   :  { %53 = vst [vmem:[#allocation7] sm:$0xff] %v52_v14  ;;  %56 = vst [vmem:[#allocation8] sm:$0xff] %v55_v15 }
  0x2a   :  { %142 = shalt.err (!%p139_p0)
}
  0x2b   :  { %66 = dma.vmem_to_hbm [thread:$0]  %s64_s22, 128, %s217_s2, [#allocation4]  }
  0x2c   :  { %s151_s27 = scalar_lea.vmem %s74_s23, 128  ;;  %p156_p2 = scmp.lt.s32.totalorder %s74_s23, %s74_s23 }
  0x2d   :  { %p152_p1 = scmp.ne.s32.totalorder %s74_s23, %s151_s27  ;;  %p157_p3 = scmp.lt.s32.totalorder %s151_s27, %s151_s27 }
  0x2f   :  { %p158_p4 = por %p157_p3, %p156_p2 }
  0x31   :  { %p159_p5 = pnand %p158_p4, %p152_p1 }
  0x33   :  { %162 = shalt.err (!%p159_p5)
}
  0x34   :  { %76 = dma.vmem_to_hbm [thread:$0]  %s74_s23, 128, %s218_s3, [#allocation9]  }
  0x35   :  { %175 = dma.done.wait [#allocation4], 128  }
  0x36   :  { %176 = vsyncadd [#allocation4], 4294967168 }
  0x37   :  { %177 = dma.done.wait [#allocation9], 128  }
  0x38   :  { %178 = vsyncadd [#allocation9], 4294967168 }
  0x39   :  { %83 = vsyncpa [#allocation3], 1 }
  0x3a   :  { %84 = vsyncpa [#allocation6], 1 }
  0x3b   :  { %85 = vsyncpa [#allocation4], 1 }
  0x3c   :  { %86 = vsyncpa [#allocation9], 1 }

</bundles_post_ra>
